<compile_context>
chip_gen: v7x
topology: tpu7x:2x2x1
jax: 0.10.0
libtpu: 0.0.40
codegen_flags: <defaults>
</compile_context>

<pallas_src>
import math
import numpy as np
import jax
import jax.numpy as jnp
from jax.experimental import pallas as pl
from jax.experimental.pallas import tpu as pltpu

D_MODEL = 100          # forced to 100 by CNN0's int(100/4)=25 output channels
LOOKBACK = 8           # "lookback" / sequence length L (PyTorch default 24; small here)
SIZE = 3               # conv kernel = SIZE - 1 = 2
SPATIAL = 3            # H = W = 3 so that 25 * 2 * 2 == d_model == 100
C_OUT = int(100 / 4)   # 25
DP = 128               # lane-dense padded feature width (multiple of 128)


def pe_kernel(xa_ref, wd_ref, x1_ref, w1b1_ref, pe_ref, o_ref):
    # Branch 1: CNN0 (2x2 conv, 1->25 ch) + bias folded into a single MXU matmul:
    #   (B*L, H*W+1) @ (H*W+1, 128) -> ReLU -> + pe   (bias rides in the ones column)
    conv = jnp.dot(xa_ref[...], wd_ref[...], preferred_element_type=jnp.float32)
    pe = pe_ref[...]
    o_ref[:, :DP] = jnp.maximum(conv, 0.0) + pe

    # Branch 2: CNN1 (1x1 conv, 1->1 ch) == scalar affine, ReLU, + pe
    w1 = w1b1_ref[0]
    b1 = w1b1_ref[1]
    o_ref[:, DP:] = jnp.maximum(x1_ref[...] * w1 + b1, 0.0) + pe


def build_pe_table(L, D):
    pos = np.arange(L, dtype=np.float32)[:, None]
    div = np.exp(np.arange(0, D, 2, dtype=np.float32) * (-math.log(10000.0) / D))
    pe = np.zeros((L, D), dtype=np.float32)
    pe[:, 0::2] = np.sin(pos * div)
    pe[:, 1::2] = np.cos(pos * div)
    return jnp.asarray(pe)


def positional_encoding_forward(x, x1, w0, b0, w1, b1):
    """x: (B, L, H, W), x1: (B, L, D). Returns (x_out, x1_out), both (B, L, D)."""
    B, L, H, W = x.shape
    D = x1.shape[-1]
    k = w0.shape[-1]              # 2
    oh, ow = H - k + 1, W - k + 1
    cout = w0.shape[0]
    assert cout * oh * ow == D, "CNN0 flattened output must equal d_model"
    assert D <= DP

    BL = B * L
    KA = H * W + 1                # im2col columns + 1 ones-column for the bias

    # Fold im2col into a dense (H*W+1, DP) weight.  Output column index
    # c*(oh*ow) + p matches PyTorch's (N, C*H*W) flatten of the NCHW conv output.
    # Last row carries the bias (multiplied by the appended ones column).
    # Columns [D, DP) stay zero (lane padding).
    w0n = np.asarray(w0)
    b0n = np.asarray(b0)
    wdense = np.zeros((KA, DP), dtype=np.float32)
    for c in range(cout):
        for p_h in range(oh):
            for p_w in range(ow):
                col = c * (oh * ow) + p_h * ow + p_w
                for dh in range(k):
                    for dw in range(k):
                        wdense[(p_h + dh) * W + (p_w + dw), col] = w0n[c, 0, dh, dw]
                wdense[H * W, col] = b0n[c]
    wdense = jnp.asarray(wdense)

    # Positional-encoding table, zero-padded to DP lanes and tiled over batch.
    pe = build_pe_table(L, D)                                        # (L, D)
    pe_pad = jnp.zeros((L, DP), jnp.float32).at[:, :D].set(pe)       # (L, DP)
    pe_full = jnp.tile(pe_pad, (B, 1))                               # (BL, DP)

    # Inputs (layout plumbing only; all compute happens in the kernel).
    xflat = x.reshape(BL, H * W).astype(jnp.float32)
    xa = jnp.concatenate([xflat, jnp.ones((BL, 1), jnp.float32)], axis=1)   # (BL, KA)
    x1flat = x1.reshape(BL, D).astype(jnp.float32)
    x1pad = jnp.zeros((BL, DP), jnp.float32).at[:, :D].set(x1flat)          # (BL, DP)
    w1b1 = jnp.array([w1[0, 0, 0, 0], b1[0]], dtype=jnp.float32)            # scalars -> SMEM

    grid_spec = pltpu.PrefetchScalarGridSpec(
        num_scalar_prefetch=0,
        grid=(1,),   # single invocation: whole problem fits trivially in VMEM
        in_specs=[
            pl.BlockSpec((BL, KA), lambda i: (0, 0)),                 # xa (im2col + ones)
            pl.BlockSpec((KA, DP), lambda i: (0, 0)),                 # dense conv weight + bias row
            pl.BlockSpec((BL, DP), lambda i: (0, 0)),                 # x1 (lane-padded)
            pl.BlockSpec(memory_space=pltpu.MemorySpace.SMEM),        # w1, b1 scalars
            pl.BlockSpec((BL, DP), lambda i: (0, 0)),                 # pe (tiled, lane-padded)
        ],
        out_specs=pl.BlockSpec((BL, 2 * DP), lambda i: (0, 0)),       # fused lane-dense slab
    )

    out = pl.pallas_call(
        pe_kernel,
        out_shape=jax.ShapeDtypeStruct((BL, 2 * DP), jnp.float32),
        grid_spec=grid_spec,
        compiler_params=pltpu.CompilerParams(dimension_semantics=("arbitrary",)),
    )(xa, wdense, x1pad, w1b1, pe_full)

    out0 = out[:, :D].reshape(B, L, D)
    out1 = out[:, DP:DP + D].reshape(B, L, D)
    return out0, out1


def reference(x, x1, w0, b0, w1, b1):
    """Pure-JAX reference mirroring the PyTorch forward."""
    B, L, H, W = x.shape
    D = x1.shape[-1]
    xin = x.reshape(B * L, 1, H, W)
    conv = jax.lax.conv_general_dilated(
        xin, w0, window_strides=(1, 1), padding="VALID",
        dimension_numbers=("NCHW", "OIHW", "NCHW"))
    conv = conv + b0[None, :, None, None]
    y0 = jnp.maximum(conv, 0.0).reshape(B * L, -1).reshape(B, L, D)
    y1 = jnp.maximum(x1.reshape(B * L, D) * w1[0, 0, 0, 0] + b1[0], 0.0).reshape(B, L, D)
    pe = build_pe_table(L, D)[None]
    return y0 + pe, y1 + pe


if __name__ == "__main__":
    key = jax.random.PRNGKey(0)
    kx, kx1, kw0, kb0, kw1, kb1 = jax.random.split(key, 6)

    B = 2
    x = jax.random.normal(kx, (B, LOOKBACK, SPATIAL, SPATIAL), dtype=jnp.float32)
    x1 = jax.random.normal(kx1, (B, LOOKBACK, D_MODEL), dtype=jnp.float32)

    # Deterministic synthetic parameters (shapes from the nn.Module __init__).
    w0 = 0.5 * jax.random.normal(kw0, (C_OUT, 1, SIZE - 1, SIZE - 1), dtype=jnp.float32)
    b0 = 0.1 * jax.random.normal(kb0, (C_OUT,), dtype=jnp.float32)
    w1 = 0.5 * jax.random.normal(kw1, (1, 1, 1, 1), dtype=jnp.float32)
    b1 = 0.1 * jax.random.normal(kb1, (1,), dtype=jnp.float32)

    out0, out1 = positional_encoding_forward(x, x1, w0, b0, w1, b1)
    jax.block_until_ready((out0, out1))

    ref0, ref1 = reference(x, x1, w0, b0, w1, b1)
    assert out0.shape == (B, LOOKBACK, D_MODEL) and out1.shape == (B, LOOKBACK, D_MODEL)
    assert np.allclose(np.asarray(out0), np.asarray(ref0), atol=1e-2, rtol=1e-2)
    assert np.allclose(np.asarray(out1), np.asarray(ref1), atol=1e-2, rtol=1e-2)
    print("KERNEL_OK")
</pallas_src>

<mosaic_0001>
module attributes {stable_mosaic.version = 11 : i64} {
  func.func @pe_kernel(%arg0: i32, %arg1: memref<16x10xf32, #tpu.memory_space<vmem>>, %arg2: memref<10x128xf32, #tpu.memory_space<vmem>>, %arg3: memref<16x128xf32, #tpu.memory_space<vmem>>, %arg4: memref<2xf32, #tpu.memory_space<smem>>, %arg5: memref<16x128xf32, #tpu.memory_space<vmem>>, %arg6: memref<16x256xf32, #tpu.memory_space<vmem>>) attributes {dimension_semantics = [#tpu.dimension_semantics<arbitrary>], iteration_bounds = array<i64: 1>, scalar_prefetch = 0 : i64, scratch_operands = 0 : i64, tpu.core_type = #tpu.core_type<tc>, window_params = [{pipeline_mode = #tpu.pipeline_mode<synchronous>, transform_indices = @transform_0, window_bounds = array<i64: 16, 10>}, {pipeline_mode = #tpu.pipeline_mode<synchronous>, transform_indices = @transform_1, window_bounds = array<i64: 10, 128>}, {pipeline_mode = #tpu.pipeline_mode<synchronous>, transform_indices = @transform_2, window_bounds = array<i64: 16, 128>}, {transform_indices = @transform_3, window_bounds = array<i64: 2>}, {pipeline_mode = #tpu.pipeline_mode<synchronous>, transform_indices = @transform_4, window_bounds = array<i64: 16, 128>}, {pipeline_mode = #tpu.pipeline_mode<synchronous>, transform_indices = @transform_5, window_bounds = array<i64: 16, 256>}]} {
    %c0 = arith.constant 0 : index
    %c0_0 = arith.constant 0 : index
    %0 = vector.load %arg1[%c0, %c0_0] : memref<16x10xf32, #tpu.memory_space<vmem>>, vector<16x10xf32>
    %c0_1 = arith.constant 0 : index
    %c0_2 = arith.constant 0 : index
    %1 = vector.load %arg2[%c0_1, %c0_2] : memref<10x128xf32, #tpu.memory_space<vmem>>, vector<10x128xf32>
    %cst = arith.constant dense<0.000000e+00> : vector<16x128xf32>
    %2 = tpu.matmul %0, %1, %cst {dimension_numbers = #tpu.dot_dimension_numbers<[1], [0], [0], [1], [0, 0, 1, 1], [], []>} : vector<16x10xf32>, vector<10x128xf32>, vector<16x128xf32> -> vector<16x128xf32>
    %c0_3 = arith.constant 0 : index
    %c0_4 = arith.constant 0 : index
    %3 = vector.load %arg5[%c0_3, %c0_4] : memref<16x128xf32, #tpu.memory_space<vmem>>, vector<16x128xf32>
    %cst_5 = arith.constant 0.000000e+00 : f32
    %4 = vector.broadcast %cst_5 : f32 to vector<16x128xf32>
    %5 = arith.maximumf %2, %4 : vector<16x128xf32>
    %6 = arith.addf %5, %3 : vector<16x128xf32>
    %c0_6 = arith.constant 0 : index
    %c0_7 = arith.constant 0 : index
    %7 = vector.load %arg6[%c0_6, %c0_7] : memref<16x256xf32, #tpu.memory_space<vmem>>, vector<16x128xf32>
    tpu.vector_store %arg6[%c0_6, %c0_7], %6 {strides = array<i32>} : memref<16x256xf32, #tpu.memory_space<vmem>>, vector<16x128xf32>,
    %c0_8 = arith.constant 0 : index
    %8 = memref.load %arg4[%c0_8] : memref<2xf32, #tpu.memory_space<smem>>
    %c1 = arith.constant 1 : index
    %9 = memref.load %arg4[%c1] : memref<2xf32, #tpu.memory_space<smem>>
    %c0_9 = arith.constant 0 : index
    %c0_10 = arith.constant 0 : index
    %10 = vector.load %arg3[%c0_9, %c0_10] : memref<16x128xf32, #tpu.memory_space<vmem>>, vector<16x128xf32>
    %11 = vector.broadcast %8 : f32 to vector<16x128xf32>
    %12 = arith.mulf %10, %11 : vector<16x128xf32>
    %13 = vector.broadcast %9 : f32 to vector<16x128xf32>
    %14 = arith.addf %12, %13 : vector<16x128xf32>
    %cst_11 = arith.constant 0.000000e+00 : f32
    %15 = vector.broadcast %cst_11 : f32 to vector<16x128xf32>
    %16 = arith.maximumf %14, %15 : vector<16x128xf32>
    %17 = arith.addf %16, %3 : vector<16x128xf32>
    %c0_12 = arith.constant 0 : index
    %c128 = arith.constant 128 : index
    %18 = vector.load %arg6[%c0_12, %c128] : memref<16x256xf32, #tpu.memory_space<vmem>>, vector<16x128xf32>
    tpu.vector_store %arg6[%c0_12, %c128], %17 {strides = array<i32>} : memref<16x256xf32, #tpu.memory_space<vmem>>, vector<16x128xf32>,
    return
  }
  func.func @transform_0(%arg0: i32) -> (i32, i32) {
    %c0_i32 = arith.constant 0 : i32
    %c0_i32_0 = arith.constant 0 : i32
    %c0_i32_1 = arith.constant 0 : i32
    return %c0_i32, %c0_i32_0 : i32, i32
  }
  func.func @transform_1(%arg0: i32) -> (i32, i32) {
    %c0_i32 = arith.constant 0 : i32
    %c0_i32_0 = arith.constant 0 : i32
    %c0_i32_1 = arith.constant 0 : i32
    return %c0_i32, %c0_i32_0 : i32, i32
  }
  func.func @transform_2(%arg0: i32) -> (i32, i32) {
    %c0_i32 = arith.constant 0 : i32
    %c0_i32_0 = arith.constant 0 : i32
    %c0_i32_1 = arith.constant 0 : i32
    return %c0_i32, %c0_i32_0 : i32, i32
  }
  func.func @transform_3(%arg0: i32) -> i32 {
    %c0_i32 = arith.constant 0 : i32
    %c0_i32_0 = arith.constant 0 : i32
    return %c0_i32 : i32
  }
  func.func @transform_4(%arg0: i32) -> (i32, i32) {
    %c0_i32 = arith.constant 0 : i32
    %c0_i32_0 = arith.constant 0 : i32
    %c0_i32_1 = arith.constant 0 : i32
    return %c0_i32, %c0_i32_0 : i32, i32
  }
  func.func @transform_5(%arg0: i32) -> (i32, i32) {
    %c0_i32 = arith.constant 0 : i32
    %c0_i32_0 = arith.constant 0 : i32
    %c0_i32_1 = arith.constant 0 : i32
    return %c0_i32, %c0_i32_0 : i32, i32
  }
}

</mosaic_0001>

<bundles_post_ra>
// kernel: tpu_custom_call.1
= control target key start
LH: loop header
LB: loop body
LE: loop exit
PB: predicated region body
PF: predicated region fallthrough
CT: control target
= control target key end

     0   :  { %10 = vsyncpa [#allocation3], 0  ;;  %s510_s0 = inlined_call_operand.hbm [shape: f32[16,10], index: 0, kind: input, shape index: {}]   ;;  %s511_s1 = inlined_call_operand.hbm [shape: f32[10,128], index: 1, kind: input, shape index: {}]   ;;  %s512_s2 = inlined_call_operand.hbm [shape: f32[16,128], index: 2, kind: input, shape index: {}]   ;;  %s513_s3 = inlined_call_operand.vmem [shape: f32[2], index: 3, kind: input, shape index: {}]   ;;  %s514_s4 = inlined_call_operand.hbm [shape: f32[16,128], index: 4, kind: input, shape index: {}]   ;;  %s515_s5 = inlined_call_operand.hbm [shape: f32[16,256], index: 5, kind: output, shape index: {}]  }
   0x1   :  { %11 = vsyncpa [#allocation7], 0 }
   0x2   :  { %12 = vsyncpa [#allocation5], 0 }
   0x3   :  { %13 = vsyncpa [#allocation11], 0 }
   0x4   :  { %14 = vsyncpa [#allocation4], 0  ;;  %s387_s18 = smov [#allocation6]   ;;  %s388_s20 = smov [#allocation2]  }
   0x5   :  { %s32_s19 = sshll.u32 %s387_s18, 4  ;;  %s20_s21 = sshll.u32 %s388_s20, 4  ;;  %s33_s19 = int_to_ptr.vmem [resolvable:$true] %s32_s19  ;;  %s428_s21 = int_to_ptr.vmem [resolvable:$true] %s20_s21 }
   0x6   :  { %s255_s24 = scalar_lea.hbm %s511_s1, 256 }
   0x7   :  { %p256_p0 = scmp.ne.s32.totalorder %s511_s1, %s255_s24  ;;  %p259_p1 = scmp.lt.u32.totalorder %s255_s24, %s511_s1 }
   0x9   :  { %p261_p2 = pnand %p259_p1, %p256_p0 }
   0xb   :  { %264 = shalt.err (!%p261_p2)
}
   0xc   :  { %s265_s29 = scalar_lea.vmem %s33_s19, 256  ;;  %p270_p4 = scmp.lt.s32.totalorder %s33_s19, %s33_s19 }
   0xd   :  { %p266_p3 = scmp.ne.s32.totalorder %s33_s19, %s265_s29  ;;  %p271_p5 = scmp.lt.s32.totalorder %s265_s29, %s265_s29 }
   0xf   :  { %p272_p6 = por %p271_p5, %p270_p4 }
  0x11   :  { %p273_p7 = pnand %p272_p6, %p266_p3 }
  0x13   :  { %276 = shalt.err (!%p273_p7)
}
  0x14   :  { %s389_s30 = smov 128   ;;  %s390_s6 = smov 8  }
  0x15   :  { %38 = dma.hbm_to_vmem [thread:$0]  %s511_s1, 256, %s33_s19, [#allocation7], %s389_s30, %s389_s30, %s390_s6  }
  0x16   :  { %s277_s11 = scalar_lea.hbm %s510_s0, 256 }
  0x17   :  { %p278_p8 = scmp.ne.s32.totalorder %s510_s0, %s277_s11  ;;  %p281_p9 = scmp.lt.u32.totalorder %s277_s11, %s510_s0 }
  0x19   :  { %p283_p10 = pnand %p281_p9, %p278_p8 }
  0x1b   :  { %286 = shalt.err (!%p283_p10)
}
  0x1c   :  { %s287_s16 = scalar_lea.vmem %s428_s21, 256  ;;  %p292_p12 = scmp.lt.s32.totalorder %s428_s21, %s428_s21 }
  0x1d   :  { %p288_p11 = scmp.ne.s32.totalorder %s428_s21, %s287_s16  ;;  %p293_p13 = scmp.lt.s32.totalorder %s287_s16, %s287_s16 }
  0x1f   :  { %p294_p0 = por %p293_p13, %p292_p12 }
  0x21   :  { %p295_p1 = pnand %p294_p0, %p288_p11 }
  0x23   :  { %298 = shalt.err (!%p295_p1)
}
  0x24   :  { %26 = dma.hbm_to_vmem [thread:$0]  %s510_s0, 256, %s428_s21, [#allocation3], %s389_s30, %s389_s30, %s390_s6  }
  0x25   :  { %s57_s20 = sshll.u32 %s513_s3, 4  ;;  %s391_s22 = smov [#allocation8]   ;;  %s58_s20 = int_to_ptr.vmem [resolvable:$true] %s57_s20 }
  0x26   :  { %s44_s23 = sshll.u32 %s391_s22, 4  ;;  %s299_s26 = scalar_lea.hbm %s512_s2, 256  ;;  %s45_s23 = int_to_ptr.vmem [resolvable:$true] %s44_s23 }
  0x27   :  { %p300_p2 = scmp.ne.s32.totalorder %s512_s2, %s299_s26  ;;  %p303_p3 = scmp.lt.u32.totalorder %s299_s26, %s512_s2 }
  0x29   :  { %p305_p4 = pnand %p303_p3, %p300_p2 }
  0x2b   :  { %308 = shalt.err (!%p305_p4)
}
  0x2c   :  { %s309_s0 = scalar_lea.vmem %s45_s23, 256  ;;  %p314_p6 = scmp.lt.s32.totalorder %s45_s23, %s45_s23 }
  0x2d   :  { %p310_p5 = scmp.ne.s32.totalorder %s45_s23, %s309_s0  ;;  %p315_p7 = scmp.lt.s32.totalorder %s309_s0, %s309_s0 }
  0x2f   :  { %p316_p8 = por %p315_p7, %p314_p6 }
  0x31   :  { %p317_p9 = pnand %p316_p8, %p310_p5 }
  0x33   :  { %320 = shalt.err (!%p317_p9)
}
  0x34   :  { %50 = dma.hbm_to_vmem [thread:$0]  %s512_s2, 256, %s45_s23, [#allocation7], %s389_s30, %s389_s30, %s390_s6  }
  0x35   :  { %s321_s8 = scalar_lea.vmem %s58_s20, 16  ;;  %p326_p11 = scmp.lt.s32.totalorder %s58_s20, %s58_s20 }
  0x36   :  { %p322_p10 = scmp.ne.s32.totalorder %s58_s20, %s321_s8  ;;  %p327_p12 = scmp.lt.s32.totalorder %s321_s8, %s321_s8 }
  0x38   :  { %p328_p13 = por %p327_p12, %p326_p11 }
  0x3a   :  { %p329_p0 = pnand %p328_p13, %p322_p10 }
  0x3c   :  { %332 = shalt.err (!%p329_p0)
}
  0x3d   :  { %s392_s9 = smov [#allocation9]   ;;  %s393_s10 = smov [#allocation10]  }
  0x3e   :  { %60 = dma.vmem_to_smem %s58_s20, 16, %s392_s9, [#allocation5]  }
  0x3f   :  { %s66_s11 = sshll.u32 %s393_s10, 4  ;;  %s333_s14 = scalar_lea.hbm %s514_s4, 256  ;;  %s67_s11 = int_to_ptr.vmem [resolvable:$true] %s66_s11 }
  0x40   :  { %p334_p1 = scmp.ne.s32.totalorder %s514_s4, %s333_s14  ;;  %p337_p2 = scmp.lt.u32.totalorder %s333_s14, %s514_s4 }
  0x42   :  { %p339_p3 = pnand %p337_p2, %p334_p1 }
  0x44   :  { %342 = shalt.err (!%p339_p3)
}
  0x45   :  { %s343_s17 = scalar_lea.vmem %s67_s11, 256  ;;  %p348_p5 = scmp.lt.s32.totalorder %s67_s11, %s67_s11 }
  0x46   :  { %p344_p4 = scmp.ne.s32.totalorder %s67_s11, %s343_s17  ;;  %p349_p6 = scmp.lt.s32.totalorder %s343_s17, %s343_s17 }
  0x48   :  { %p350_p7 = por %p349_p6, %p348_p5 }
  0x4a   :  { %p351_p8 = pnand %p350_p7, %p344_p4 }
  0x4c   :  { %354 = shalt.err (!%p351_p8)
}
  0x4d   :  { %72 = dma.hbm_to_vmem [thread:$0]  %s514_s4, 256, %s67_s11, [#allocation11], %s389_s30, %s389_s30, %s390_s6  }
  0x4e   :  { %377 = dma.done.wait [#allocation3], 256  }
  0x4f   :  { %378 = vsyncadd [#allocation3], 4294967040 }
  0x50   :  { %379 = dma.done.wait [#allocation7], 512  }
  0x51   :  { %380 = vsyncadd [#allocation7], 4294966784 }
  0x52   :  { %381 = dma.done.wait [#allocation5], 16  }
  0x53   :  { %382 = vsyncadd [#allocation5], 4294967280 }
  0x54   :  { %383 = dma.done.wait [#allocation11], 256  }
  0x55   :  { %384 = vsyncadd [#allocation11], 4294967040 }
  0x56   :  { %88 = sfence }
  0x57   :  { %v91_v0 = vld [vmem:[#allocation6] sm:$0xff]  ;;  %v92_v1 = vld [vmem:[#allocation6 + $0x8] sm:$0x3]  ;;  %vm100_vm0 = vcmask 1041408   ;;  %v89_v2 = vld [vmem:[#allocation2] sm:$0xff]  ;;  %vm394_vm1 = vmmov 1  }
  0x58   :  { %v238_v3 = vpack.c.bf16 %v92_v1, %v91_v0  ;;  %vm239_vm2 = vmpackc.low %vm100_vm0, %vm394_vm1  ;;  %vm93_vm3 = vcmask 80896   ;;  %v90_v4 = vld [vmem:[#allocation2 + $0x8] sm:$0xff]  ;;  %s187_s4 = sld [smem:[#allocation9]]  ;;  %s226_s30 = sld [smem:[#allocation9 + $0x1]]  ;;  %v189_v7 = vld [vmem:[#allocation8] sm:$0xff] }
  0x59   :  { %235 = vmatprep.mubr.msk.f32.mxu0 %vm93_vm3, %v89_v2  ;;  %v190_v5 = vld [vmem:[#allocation8 + $0x8] sm:$0xff]  ;;  %v180_v13 = vld [vmem:[#allocation10 + $0x8] sm:$0xff]  ;;  %v179_v16 = vld [vmem:[#allocation10] sm:$0xff]  ;;  %s395_s6 = smov [#allocation12]  }
  0x5a   :  { %240 = vmatprep.subr.msk.bf16.mxu0 %vm239_vm2, %v238_v3  ;;  %s208_s20 = sshll.u32 %s395_s6, 4  ;;  %s209_s20 = int_to_ptr.vmem [resolvable:$true] %s208_s20 }
  0x5b   :  { %243 = vmatpush3.bf16.msk.msra.mxu0 %vm239_vm2, %v238_v3  ;;  %s355_s22 = scalar_lea.vmem %s209_s20, 512  ;;  %p360_p10 = scmp.lt.s32.totalorder %s209_s20, %s209_s20 }
  0x5c   :  { %p356_p9 = scmp.ne.s32.totalorder %s209_s20, %s355_s22  ;;  %p361_p11 = scmp.lt.s32.totalorder %s355_s22, %s355_s22 }
  0x5e   :  { %236 = vmatmul.mubr.msk.f32.vlgmr.msra.gmra.mrb[0].mxu0 %vm93_vm3, %v90_v4  ;;  %v191_v6 = vstv %s187_s4  ;;  %v194_v10 = vstv %s226_s30  ;;  %p362_p12 = por %p361_p11, %p360_p10 }
  0x5f   :  { %v193_v8 = vmul.f32 %v191_v6, %v190_v5  ;;  %v192_v9 = vmul.f32 %v191_v6, %v189_v7 }
  0x60   :  { %p363_p13 = pnand %p362_p12, %p356_p9 }
  0x61   :  { %v196_v11 = vadd.f32 %v194_v10, %v193_v8  ;;  %v195_v12 = vadd.f32 %v194_v10, %v192_v9 }
  0x63   :  { %v198_v14 = vmax.f32 %v196_v11, 0.0  ;;  %v197_v15 = vmax.f32 %v195_v12, 0.0 }
  0x65   :  { %v200_v17 = vadd.f32 %v198_v14, %v180_v13  ;;  %v199_v18 = vadd.f32 %v197_v15, %v179_v16 }
  0x67   :  { %202 = vst [vmem:[#allocation12 + $0x18] sm:$0xff] %v200_v17  ;;  %201 = vst [vmem:[#allocation12 + $0x8] sm:$0xff] %v199_v18 }
 0x131   :  { %v237_v19 = vpop.f32.mrb[0].mxu0 }
 0x132   :  { %v182_v20 = vmax.f32 %v237_v19, 0.0  ;;  %v170_v21 = vpop.f32.mrb[1].mxu0 }
 0x133   :  { %v181_v22 = vmax.f32 %v170_v21, 0.0 }
 0x134   :  { %v184_v23 = vadd.f32 %v182_v20, %v180_v13 }
 0x135   :  { %v183_v24 = vadd.f32 %v181_v22, %v179_v16 }
 0x136   :  { %186 = vst [vmem:[#allocation12 + $0x10] sm:$0xff] %v184_v23 }
 0x137   :  { %185 = vst [vmem:[#allocation12] sm:$0xff] %v183_v24 }
 0x138   :  { %366 = shalt.err (!%p363_p13)
}
 0x139   :  { %s367_s25 = scalar_lea.hbm %s515_s5, 512 }
 0x13a   :  { %p368_p0 = scmp.ne.s32.totalorder %s515_s5, %s367_s25  ;;  %p371_p1 = scmp.lt.u32.totalorder %s367_s25, %s515_s5 }
 0x13c   :  { %p373_p2 = pnand %p371_p1, %p368_p0 }
 0x13e   :  { %376 = shalt.err (!%p373_p2)
}
 0x13f   :  { %s396_s7 = smov 256   ;;  %s397_s0 = smov 16  }
 0x140   :  { %214 = dma.vmem_to_hbm [thread:$0]  %s209_s20, 512, %s515_s5, [#allocation4], %s396_s7, %s396_s7, %s397_s0  }
 0x141   :  { %385 = dma.done.wait [#allocation4], 512  }
 0x142   :  { %386 = vsyncadd [#allocation4], 4294966784 }
 0x143   :  { %218 = vsyncpa [#allocation3], 1 }
 0x144   :  { %219 = vsyncpa [#allocation7], 1 }
 0x145   :  { %220 = vsyncpa [#allocation11], 1 }
 0x146   :  { %221 = vsyncpa [#allocation4], 1 }
 0x147   :  { %222 = vsyncpa [#allocation5], 1 }

</bundles_post_ra>
